<compile_context>
chip_gen: v6e
topology: v6e:2x2x1
jax: 0.10.0
libtpu: 0.0.40
codegen_flags: <defaults>
</compile_context>

<pallas_src>
import numpy as np

import jax
import jax.numpy as jnp
from jax.experimental import pallas as pl
from jax.experimental.pallas import tpu as pltpu

C_IN = 3
C_OUT = 6
KH = KW = 3
EPS = 1e-5

# Tap offsets (dh, dw) in the same order as the (kh, kw) weight layout.
_OFFSETS = tuple((dh, dw) for dh in (-1, 0, 1) for dw in (-1, 0, 1))


def _tap_masks(H, W):
    """(9, 1, H*W) float32 0/1 masks: 1 where the (dh, dw)-shifted source pixel
    lies inside the image (implements the conv's zero padding)."""
    h = np.repeat(np.arange(H), W)
    w = np.tile(np.arange(W), H)
    masks = np.zeros((KH * KW, 1, H * W), np.float32)
    for t, (dh, dw) in enumerate(_OFFSETS):
        valid = (h + dh >= 0) & (h + dh < H) & (w + dw >= 0) & (w + dw < W)
        masks[t, 0] = valid.astype(np.float32)
    return masks


def _make_kernel(H, W, bb):
    HW = H * W

    def kernel(x_ref, w_ref, gb_ref, mask_ref, o_ref):
        # x_ref   : (BB, C_IN, HW)    raw activations, lane-dense
        # w_ref   : (9, C_OUT, C_IN)  conv weight, one (6,3) matrix per tap
        # gb_ref  : (C_OUT, 2)        col 0 = gamma, col 1 = beta
        # mask_ref: (9, 1, HW)        0/1 validity mask per tap (zero padding)
        # o_ref   : (BB, C_OUT, HW)
        gamma = gb_ref[:, 0:1]                       # (C_OUT, 1)
        beta = gb_ref[:, 1:2]                        # (C_OUT, 1)
        # Hoist batch-invariant loads out of the unrolled batch loop.
        w_taps = [w_ref[t] for t in range(KH * KW)]
        masks = [mask_ref[t] for t in range(KH * KW)]

        for b in range(bb):                          # static & tiny -> unrolled
            x_b = x_ref[b]                           # (C_IN, HW)
            acc = None
            for t, (dh, dw) in enumerate(_OFFSETS):
                s = dh * W + dw
                if s == 0:
                    tap = x_b                        # center tap: no shift/mask
                else:
                    # rolled[:, q] = x_b[:, (q + s) % HW]; any wrap-around
                    # lands only on border positions, which the mask zeroes.
                    tap = pltpu.roll(x_b, shift=(-s) % HW, axis=1) * masks[t]
                part = jnp.dot(w_taps[t], tap,
                               preferred_element_type=jnp.float32)
                acc = part if acc is None else acc + part
            # InstanceNorm2d (biased variance over spatial dims, per (n, c)).
            # Conv bias omitted: it cancels under the mean subtraction.
            mean = jnp.mean(acc, axis=1, keepdims=True)
            centered = acc - mean
            var = jnp.mean(centered * centered, axis=1, keepdims=True)
            scale = jax.lax.rsqrt(var + EPS) * gamma  # fold gamma into scale
            o_ref[b] = (centered * scale + beta).astype(o_ref.dtype)

    return kernel


def _tensorcores_per_chip() -> int:
    """v7x exposes 2 TensorCores per chip (worth a 2-step parallel grid);
    v5e / v6e are single-TC, where extra grid steps are pure overhead."""
    try:
        kind = jax.devices()[0].device_kind.lower()
    except Exception:
        return 1
    return 2 if "v7" in kind else 1


def simple_module_forward(x, conv_w, conv_b, gamma, beta):
    # x: (N, C_IN, H, W) float32.  conv_b is accepted for API parity but is
    # mathematically redundant under InstanceNorm (cancels in mean subtraction).
    del conv_b
    N, _, H, W = x.shape
    HW = H * W

    x_flat = x.reshape(N, C_IN, HW)                    # free reshape, no copy
    # (O, C, KH, KW) -> (KH, KW, O, C) -> (9, O, C): per-tap weight matrices.
    w_taps = jnp.transpose(conv_w, (2, 3, 0, 1)).reshape(KH * KW, C_OUT, C_IN)
    gb = jnp.stack([gamma, beta], axis=1)              # (C_OUT, 2)
    masks = jnp.asarray(_tap_masks(H, W))              # (9, 1, HW)

    # Grid: single step on single-TC chips; 2 parallel batch steps on v7x.
    G = 2 if (_tensorcores_per_chip() >= 2 and N >= 2) else 1
    BB = pl.cdiv(N, G)
    Np = G * BB
    if Np != N:
        x_flat = jnp.pad(x_flat, ((0, Np - N), (0, 0), (0, 0)))

    grid_spec = pltpu.PrefetchScalarGridSpec(
        num_scalar_prefetch=0,
        grid=(G,),
        in_specs=[
            pl.BlockSpec((BB, C_IN, HW), lambda g: (g, 0, 0)),
            pl.BlockSpec((KH * KW, C_OUT, C_IN), lambda g: (0, 0, 0)),
            pl.BlockSpec((C_OUT, 2), lambda g: (0, 0)),
            pl.BlockSpec((KH * KW, 1, HW), lambda g: (0, 0, 0)),
        ],
        out_specs=pl.BlockSpec((BB, C_OUT, HW), lambda g: (g, 0, 0)),
    )

    flops = 2 * Np * C_OUT * C_IN * KH * KW * HW
    bytes_accessed = 4 * (int(x_flat.size) + int(w_taps.size) + int(gb.size)
                          + int(masks.size) + Np * C_OUT * HW)
    cost = pl.CostEstimate(flops=flops, transcendentals=Np * C_OUT,
                           bytes_accessed=bytes_accessed)

    out = pl.pallas_call(
        _make_kernel(H, W, BB),
        out_shape=jax.ShapeDtypeStruct((Np, C_OUT, HW), jnp.float32),
        grid_spec=grid_spec,
        compiler_params=pltpu.CompilerParams(
            dimension_semantics=("parallel",)),
        cost_estimate=cost,
    )(x_flat, w_taps, gb, masks)

    # TODO(synk): for large images add an HW-tiling grid axis with a two-pass
    # InstanceNorm (sum / sum-of-squares accumulation) so blocks stay within
    # v7x's 64 MiB VMEM; at 16x16 the whole image fits trivially.
    return out[:N].reshape(N, C_OUT, H, W)


def reference_forward(x, conv_w, conv_b, gamma, beta):
    # Pure-JAX reference for validation (includes the conv bias, which the
    # kernel legitimately drops -- results must still match).
    y = jax.lax.conv_general_dilated(
        x, conv_w, window_strides=(1, 1), padding=((1, 1), (1, 1)),
        dimension_numbers=("NCHW", "OIHW", "NCHW"))
    y = y + conv_b.reshape(1, C_OUT, 1, 1)
    mean = jnp.mean(y, axis=(2, 3), keepdims=True)
    var = jnp.mean((y - mean) ** 2, axis=(2, 3), keepdims=True)
    y = (y - mean) * jax.lax.rsqrt(var + EPS)
    return y * gamma.reshape(1, C_OUT, 1, 1) + beta.reshape(1, C_OUT, 1, 1)


if __name__ == "__main__":
    key = jax.random.PRNGKey(0)
    k_x, k_w, k_b, k_g, k_be = jax.random.split(key, 5)

    N, H, W = 2, 16, 16
    x = jax.random.normal(k_x, (N, C_IN, H, W), dtype=jnp.float32)

    # PyTorch-style fan-in uniform init for conv; non-trivial affine params to
    # exercise the gamma-fold / beta paths (default torch init is 1 / 0).
    fan_in = C_IN * KH * KW
    bound = 1.0 / (fan_in ** 0.5)
    conv_w = jax.random.uniform(k_w, (C_OUT, C_IN, KH, KW),
                                minval=-bound, maxval=bound, dtype=jnp.float32)
    conv_b = jax.random.uniform(k_b, (C_OUT,),
                                minval=-bound, maxval=bound, dtype=jnp.float32)
    gamma = 1.0 + 0.1 * jax.random.normal(k_g, (C_OUT,), dtype=jnp.float32)
    beta = 0.1 * jax.random.normal(k_be, (C_OUT,), dtype=jnp.float32)

    out = simple_module_forward(x, conv_w, conv_b, gamma, beta)
    out = jax.block_until_ready(out)

    ref = reference_forward(x, conv_w, conv_b, gamma, beta)
    assert out.shape == (N, C_OUT, H, W)
    assert jnp.allclose(out, ref, atol=1e-4, rtol=1e-4), \
        f"max abs err {jnp.max(jnp.abs(out - ref))}"

    print("KERNEL_OK")
</pallas_src>

<mosaic_0001>
module attributes {stable_mosaic.version = 11 : i64} {
  func.func @kernel(%arg0: i32, %arg1: memref<2x3x256xf32, #tpu.memory_space<vmem>>, %arg2: memref<9x6x3xf32, #tpu.memory_space<vmem>>, %arg3: memref<6x2xf32, #tpu.memory_space<vmem>>, %arg4: memref<9x1x256xf32, #tpu.memory_space<vmem>>, %arg5: memref<2x6x256xf32, #tpu.memory_space<vmem>>) attributes {dimension_semantics = [#tpu.dimension_semantics<parallel>], iteration_bounds = array<i64: 1>, scalar_prefetch = 0 : i64, scratch_operands = 0 : i64, tpu.core_type = #tpu.core_type<tc>, window_params = [{transform_indices = @transform_0, window_bounds = array<i64: 2, 3, 256>}, {pipeline_mode = #tpu.pipeline_mode<synchronous>, transform_indices = @transform_1, window_bounds = array<i64: 9, 6, 3>}, {pipeline_mode = #tpu.pipeline_mode<synchronous>, transform_indices = @transform_2, window_bounds = array<i64: 6, 2>}, {pipeline_mode = #tpu.pipeline_mode<synchronous>, transform_indices = @transform_3, window_bounds = array<i64: 9, 1, 256>}, {transform_indices = @transform_4, window_bounds = array<i64: 2, 6, 256>}]} {
    %c0 = arith.constant 0 : index
    %c0_0 = arith.constant 0 : index
    %0 = vector.load %arg3[%c0, %c0_0] : memref<6x2xf32, #tpu.memory_space<vmem>>, vector<6x1xf32>
    %c0_1 = arith.constant 0 : index
    %c1 = arith.constant 1 : index
    %1 = vector.load %arg3[%c0_1, %c1] : memref<6x2xf32, #tpu.memory_space<vmem>>, vector<6x1xf32>
    %c0_2 = arith.constant 0 : index
    %c0_3 = arith.constant 0 : index
    %c0_4 = arith.constant 0 : index
    %2 = vector.load %arg2[%c0_2, %c0_3, %c0_4] : memref<9x6x3xf32, #tpu.memory_space<vmem>>, vector<1x6x3xf32>
    %3 = vector.shape_cast %2 : vector<1x6x3xf32> to vector<6x3xf32>
    %c1_5 = arith.constant 1 : index
    %c0_6 = arith.constant 0 : index
    %c0_7 = arith.constant 0 : index
    %4 = vector.load %arg2[%c1_5, %c0_6, %c0_7] : memref<9x6x3xf32, #tpu.memory_space<vmem>>, vector<1x6x3xf32>
    %5 = vector.shape_cast %4 : vector<1x6x3xf32> to vector<6x3xf32>
    %c2 = arith.constant 2 : index
    %c0_8 = arith.constant 0 : index
    %c0_9 = arith.constant 0 : index
    %6 = vector.load %arg2[%c2, %c0_8, %c0_9] : memref<9x6x3xf32, #tpu.memory_space<vmem>>, vector<1x6x3xf32>
    %7 = vector.shape_cast %6 : vector<1x6x3xf32> to vector<6x3xf32>
    %c3 = arith.constant 3 : index
    %c0_10 = arith.constant 0 : index
    %c0_11 = arith.constant 0 : index
    %8 = vector.load %arg2[%c3, %c0_10, %c0_11] : memref<9x6x3xf32, #tpu.memory_space<vmem>>, vector<1x6x3xf32>
    %9 = vector.shape_cast %8 : vector<1x6x3xf32> to vector<6x3xf32>
    %c4 = arith.constant 4 : index
    %c0_12 = arith.constant 0 : index
    %c0_13 = arith.constant 0 : index
    %10 = vector.load %arg2[%c4, %c0_12, %c0_13] : memref<9x6x3xf32, #tpu.memory_space<vmem>>, vector<1x6x3xf32>
    %11 = vector.shape_cast %10 : vector<1x6x3xf32> to vector<6x3xf32>
    %c5 = arith.constant 5 : index
    %c0_14 = arith.constant 0 : index
    %c0_15 = arith.constant 0 : index
    %12 = vector.load %arg2[%c5, %c0_14, %c0_15] : memref<9x6x3xf32, #tpu.memory_space<vmem>>, vector<1x6x3xf32>
    %13 = vector.shape_cast %12 : vector<1x6x3xf32> to vector<6x3xf32>
    %c6 = arith.constant 6 : index
    %c0_16 = arith.constant 0 : index
    %c0_17 = arith.constant 0 : index
    %14 = vector.load %arg2[%c6, %c0_16, %c0_17] : memref<9x6x3xf32, #tpu.memory_space<vmem>>, vector<1x6x3xf32>
    %15 = vector.shape_cast %14 : vector<1x6x3xf32> to vector<6x3xf32>
    %c7 = arith.constant 7 : index
    %c0_18 = arith.constant 0 : index
    %c0_19 = arith.constant 0 : index
    %16 = vector.load %arg2[%c7, %c0_18, %c0_19] : memref<9x6x3xf32, #tpu.memory_space<vmem>>, vector<1x6x3xf32>
    %17 = vector.shape_cast %16 : vector<1x6x3xf32> to vector<6x3xf32>
    %c8 = arith.constant 8 : index
    %c0_20 = arith.constant 0 : index
    %c0_21 = arith.constant 0 : index
    %18 = vector.load %arg2[%c8, %c0_20, %c0_21] : memref<9x6x3xf32, #tpu.memory_space<vmem>>, vector<1x6x3xf32>
    %19 = vector.shape_cast %18 : vector<1x6x3xf32> to vector<6x3xf32>
    %c0_22 = arith.constant 0 : index
    %c0_23 = arith.constant 0 : index
    %c0_24 = arith.constant 0 : index
    %20 = vector.load %arg4[%c0_22, %c0_23, %c0_24] : memref<9x1x256xf32, #tpu.memory_space<vmem>>, vector<1x1x256xf32>
    %21 = vector.shape_cast %20 : vector<1x1x256xf32> to vector<1x256xf32>
    %c1_25 = arith.constant 1 : index
    %c0_26 = arith.constant 0 : index
    %c0_27 = arith.constant 0 : index
    %22 = vector.load %arg4[%c1_25, %c0_26, %c0_27] : memref<9x1x256xf32, #tpu.memory_space<vmem>>, vector<1x1x256xf32>
    %23 = vector.shape_cast %22 : vector<1x1x256xf32> to vector<1x256xf32>
    %c2_28 = arith.constant 2 : index
    %c0_29 = arith.constant 0 : index
    %c0_30 = arith.constant 0 : index
    %24 = vector.load %arg4[%c2_28, %c0_29, %c0_30] : memref<9x1x256xf32, #tpu.memory_space<vmem>>, vector<1x1x256xf32>
    %25 = vector.shape_cast %24 : vector<1x1x256xf32> to vector<1x256xf32>
    %c3_31 = arith.constant 3 : index
    %c0_32 = arith.constant 0 : index
    %c0_33 = arith.constant 0 : index
    %26 = vector.load %arg4[%c3_31, %c0_32, %c0_33] : memref<9x1x256xf32, #tpu.memory_space<vmem>>, vector<1x1x256xf32>
    %27 = vector.shape_cast %26 : vector<1x1x256xf32> to vector<1x256xf32>
    %c5_34 = arith.constant 5 : index
    %c0_35 = arith.constant 0 : index
    %c0_36 = arith.constant 0 : index
    %28 = vector.load %arg4[%c5_34, %c0_35, %c0_36] : memref<9x1x256xf32, #tpu.memory_space<vmem>>, vector<1x1x256xf32>
    %29 = vector.shape_cast %28 : vector<1x1x256xf32> to vector<1x256xf32>
    %c6_37 = arith.constant 6 : index
    %c0_38 = arith.constant 0 : index
    %c0_39 = arith.constant 0 : index
    %30 = vector.load %arg4[%c6_37, %c0_38, %c0_39] : memref<9x1x256xf32, #tpu.memory_space<vmem>>, vector<1x1x256xf32>
    %31 = vector.shape_cast %30 : vector<1x1x256xf32> to vector<1x256xf32>
    %c7_40 = arith.constant 7 : index
    %c0_41 = arith.constant 0 : index
    %c0_42 = arith.constant 0 : index
    %32 = vector.load %arg4[%c7_40, %c0_41, %c0_42] : memref<9x1x256xf32, #tpu.memory_space<vmem>>, vector<1x1x256xf32>
    %33 = vector.shape_cast %32 : vector<1x1x256xf32> to vector<1x256xf32>
    %c8_43 = arith.constant 8 : index
    %c0_44 = arith.constant 0 : index
    %c0_45 = arith.constant 0 : index
    %34 = vector.load %arg4[%c8_43, %c0_44, %c0_45] : memref<9x1x256xf32, #tpu.memory_space<vmem>>, vector<1x1x256xf32>
    %35 = vector.shape_cast %34 : vector<1x1x256xf32> to vector<1x256xf32>
    %c0_46 = arith.constant 0 : index
    %c0_47 = arith.constant 0 : index
    %c0_48 = arith.constant 0 : index
    %36 = vector.load %arg1[%c0_46, %c0_47, %c0_48] : memref<2x3x256xf32, #tpu.memory_space<vmem>>, vector<1x3x256xf32>
    %37 = vector.shape_cast %36 : vector<1x3x256xf32> to vector<3x256xf32>
    %c17_i32 = arith.constant 17 : i32
    %38 = tpu.dynamic_rotate %37 by %c17_i32 dim 1 : vector<3x256xf32>, i32 -> vector<3x256xf32>
    %39 = vector.broadcast %21 : vector<1x256xf32> to vector<3x256xf32>
    %40 = arith.mulf %38, %39 : vector<3x256xf32>
    %cst = arith.constant dense<0.000000e+00> : vector<6x256xf32>
    %41 = tpu.matmul %3, %40, %cst {dimension_numbers = #tpu.dot_dimension_numbers<[1], [0], [0], [1], [0, 0, 1, 1], [], []>} : vector<6x3xf32>, vector<3x256xf32>, vector<6x256xf32> -> vector<6x256xf32>
    %c16_i32 = arith.constant 16 : i32
    %42 = tpu.dynamic_rotate %37 by %c16_i32 dim 1 : vector<3x256xf32>, i32 -> vector<3x256xf32>
    %43 = vector.broadcast %23 : vector<1x256xf32> to vector<3x256xf32>
    %44 = arith.mulf %42, %43 : vector<3x256xf32>
    %cst_49 = arith.constant dense<0.000000e+00> : vector<6x256xf32>
    %45 = tpu.matmul %5, %44, %cst_49 {dimension_numbers = #tpu.dot_dimension_numbers<[1], [0], [0], [1], [0, 0, 1, 1], [], []>} : vector<6x3xf32>, vector<3x256xf32>, vector<6x256xf32> -> vector<6x256xf32>
    %46 = arith.addf %41, %45 : vector<6x256xf32>
    %c15_i32 = arith.constant 15 : i32
    %47 = tpu.dynamic_rotate %37 by %c15_i32 dim 1 : vector<3x256xf32>, i32 -> vector<3x256xf32>
    %48 = vector.broadcast %25 : vector<1x256xf32> to vector<3x256xf32>
    %49 = arith.mulf %47, %48 : vector<3x256xf32>
    %cst_50 = arith.constant dense<0.000000e+00> : vector<6x256xf32>
    %50 = tpu.matmul %7, %49, %cst_50 {dimension_numbers = #tpu.dot_dimension_numbers<[1], [0], [0], [1], [0, 0, 1, 1], [], []>} : vector<6x3xf32>, vector<3x256xf32>, vector<6x256xf32> -> vector<6x256xf32>
    %51 = arith.addf %46, %50 : vector<6x256xf32>
    %c1_i32 = arith.constant 1 : i32
    %52 = tpu.dynamic_rotate %37 by %c1_i32 dim 1 : vector<3x256xf32>, i32 -> vector<3x256xf32>
    %53 = vector.broadcast %27 : vector<1x256xf32> to vector<3x256xf32>
    %54 = arith.mulf %52, %53 : vector<3x256xf32>
    %cst_51 = arith.constant dense<0.000000e+00> : vector<6x256xf32>
    %55 = tpu.matmul %9, %54, %cst_51 {dimension_numbers = #tpu.dot_dimension_numbers<[1], [0], [0], [1], [0, 0, 1, 1], [], []>} : vector<6x3xf32>, vector<3x256xf32>, vector<6x256xf32> -> vector<6x256xf32>
    %56 = arith.addf %51, %55 : vector<6x256xf32>
    %cst_52 = arith.constant dense<0.000000e+00> : vector<6x256xf32>
    %57 = tpu.matmul %11, %37, %cst_52 {dimension_numbers = #tpu.dot_dimension_numbers<[1], [0], [0], [1], [0, 0, 1, 1], [], []>} : vector<6x3xf32>, vector<3x256xf32>, vector<6x256xf32> -> vector<6x256xf32>
    %58 = arith.addf %56, %57 : vector<6x256xf32>
    %c255_i32 = arith.constant 255 : i32
    %59 = tpu.dynamic_rotate %37 by %c255_i32 dim 1 : vector<3x256xf32>, i32 -> vector<3x256xf32>
    %60 = vector.broadcast %29 : vector<1x256xf32> to vector<3x256xf32>
    %61 = arith.mulf %59, %60 : vector<3x256xf32>
    %cst_53 = arith.constant dense<0.000000e+00> : vector<6x256xf32>
    %62 = tpu.matmul %13, %61, %cst_53 {dimension_numbers = #tpu.dot_dimension_numbers<[1], [0], [0], [1], [0, 0, 1, 1], [], []>} : vector<6x3xf32>, vector<3x256xf32>, vector<6x256xf32> -> vector<6x256xf32>
    %63 = arith.addf %58, %62 : vector<6x256xf32>
    %c241_i32 = arith.constant 241 : i32
    %64 = tpu.dynamic_rotate %37 by %c241_i32 dim 1 : vector<3x256xf32>, i32 -> vector<3x256xf32>
    %65 = vector.broadcast %31 : vector<1x256xf32> to vector<3x256xf32>
    %66 = arith.mulf %64, %65 : vector<3x256xf32>
    %cst_54 = arith.constant dense<0.000000e+00> : vector<6x256xf32>
    %67 = tpu.matmul %15, %66, %cst_54 {dimension_numbers = #tpu.dot_dimension_numbers<[1], [0], [0], [1], [0, 0, 1, 1], [], []>} : vector<6x3xf32>, vector<3x256xf32>, vector<6x256xf32> -> vector<6x256xf32>
    %68 = arith.addf %63, %67 : vector<6x256xf32>
    %c240_i32 = arith.constant 240 : i32
    %69 = tpu.dynamic_rotate %37 by %c240_i32 dim 1 : vector<3x256xf32>, i32 -> vector<3x256xf32>
    %70 = vector.broadcast %33 : vector<1x256xf32> to vector<3x256xf32>
    %71 = arith.mulf %69, %70 : vector<3x256xf32>
    %cst_55 = arith.constant dense<0.000000e+00> : vector<6x256xf32>
    %72 = tpu.matmul %17, %71, %cst_55 {dimension_numbers = #tpu.dot_dimension_numbers<[1], [0], [0], [1], [0, 0, 1, 1], [], []>} : vector<6x3xf32>, vector<3x256xf32>, vector<6x256xf32> -> vector<6x256xf32>
    %73 = arith.addf %68, %72 : vector<6x256xf32>
    %c239_i32 = arith.constant 239 : i32
    %74 = tpu.dynamic_rotate %37 by %c239_i32 dim 1 : vector<3x256xf32>, i32 -> vector<3x256xf32>
    %75 = vector.broadcast %35 : vector<1x256xf32> to vector<3x256xf32>
    %76 = arith.mulf %74, %75 : vector<3x256xf32>
    %cst_56 = arith.constant dense<0.000000e+00> : vector<6x256xf32>
    %77 = tpu.matmul %19, %76, %cst_56 {dimension_numbers = #tpu.dot_dimension_numbers<[1], [0], [0], [1], [0, 0, 1, 1], [], []>} : vector<6x3xf32>, vector<3x256xf32>, vector<6x256xf32> -> vector<6x256xf32>
    %78 = arith.addf %73, %77 : vector<6x256xf32>
    %cst_57 = arith.constant dense<0.000000e+00> : vector<6xf32>
    %79 = vector.multi_reduction <add>, %78, %cst_57 [1] : vector<6x256xf32> to vector<6xf32>
    %80 = vector.shape_cast %79 : vector<6xf32> to vector<6x1xf32>
    %cst_58 = arith.constant 2.560000e+02 : f32
    %81 = vector.broadcast %cst_58 : f32 to vector<6x1xf32>
    %82 = arith.divf %80, %81 : vector<6x1xf32>
    %83 = vector.broadcast %82 : vector<6x1xf32> to vector<6x256xf32>
    %84 = arith.subf %78, %83 : vector<6x256xf32>
    %85 = arith.mulf %84, %84 : vector<6x256xf32>
    %cst_59 = arith.constant dense<0.000000e+00> : vector<6xf32>
    %86 = vector.multi_reduction <add>, %85, %cst_59 [1] : vector<6x256xf32> to vector<6xf32>
    %87 = vector.shape_cast %86 : vector<6xf32> to vector<6x1xf32>
    %cst_60 = arith.constant 2.560000e+02 : f32
    %88 = vector.broadcast %cst_60 : f32 to vector<6x1xf32>
    %89 = arith.divf %87, %88 : vector<6x1xf32>
    %cst_61 = arith.constant 9.99999974E-6 : f32
    %90 = vector.broadcast %cst_61 : f32 to vector<6x1xf32>
    %91 = arith.addf %89, %90 : vector<6x1xf32>
    %92 = math.rsqrt %91 : vector<6x1xf32>
    %93 = arith.mulf %92, %0 : vector<6x1xf32>
    %94 = vector.broadcast %93 : vector<6x1xf32> to vector<6x256xf32>
    %95 = arith.mulf %84, %94 : vector<6x256xf32>
    %96 = vector.broadcast %1 : vector<6x1xf32> to vector<6x256xf32>
    %97 = arith.addf %95, %96 : vector<6x256xf32>
    %c0_62 = arith.constant 0 : index
    %c0_63 = arith.constant 0 : index
    %c0_64 = arith.constant 0 : index
    %98 = vector.load %arg5[%c0_62, %c0_63, %c0_64] : memref<2x6x256xf32, #tpu.memory_space<vmem>>, vector<1x6x256xf32>
    %99 = vector.shape_cast %98 : vector<1x6x256xf32> to vector<6x256xf32>
    %100 = vector.shape_cast %97 : vector<6x256xf32> to vector<1x6x256xf32>
    tpu.vector_store %arg5[%c0_62, %c0_63, %c0_64], %100 {strides = array<i32>} : memref<2x6x256xf32, #tpu.memory_space<vmem>>, vector<1x6x256xf32>,
    %c1_65 = arith.constant 1 : index
    %c0_66 = arith.constant 0 : index
    %c0_67 = arith.constant 0 : index
    %101 = vector.load %arg1[%c1_65, %c0_66, %c0_67] : memref<2x3x256xf32, #tpu.memory_space<vmem>>, vector<1x3x256xf32>
    %102 = vector.shape_cast %101 : vector<1x3x256xf32> to vector<3x256xf32>
    %c17_i32_68 = arith.constant 17 : i32
    %103 = tpu.dynamic_rotate %102 by %c17_i32_68 dim 1 : vector<3x256xf32>, i32 -> vector<3x256xf32>
    %104 = vector.broadcast %21 : vector<1x256xf32> to vector<3x256xf32>
    %105 = arith.mulf %103, %104 : vector<3x256xf32>
    %cst_69 = arith.constant dense<0.000000e+00> : vector<6x256xf32>
    %106 = tpu.matmul %3, %105, %cst_69 {dimension_numbers = #tpu.dot_dimension_numbers<[1], [0], [0], [1], [0, 0, 1, 1], [], []>} : vector<6x3xf32>, vector<3x256xf32>, vector<6x256xf32> -> vector<6x256xf32>
    %c16_i32_70 = arith.constant 16 : i32
    %107 = tpu.dynamic_rotate %102 by %c16_i32_70 dim 1 : vector<3x256xf32>, i32 -> vector<3x256xf32>
    %108 = vector.broadcast %23 : vector<1x256xf32> to vector<3x256xf32>
    %109 = arith.mulf %107, %108 : vector<3x256xf32>
    %cst_71 = arith.constant dense<0.000000e+00> : vector<6x256xf32>
    %110 = tpu.matmul %5, %109, %cst_71 {dimension_numbers = #tpu.dot_dimension_numbers<[1], [0], [0], [1], [0, 0, 1, 1], [], []>} : vector<6x3xf32>, vector<3x256xf32>, vector<6x256xf32> -> vector<6x256xf32>
    %111 = arith.addf %106, %110 : vector<6x256xf32>
    %c15_i32_72 = arith.constant 15 : i32
    %112 = tpu.dynamic_rotate %102 by %c15_i32_72 dim 1 : vector<3x256xf32>, i32 -> vector<3x256xf32>
    %113 = vector.broadcast %25 : vector<1x256xf32> to vector<3x256xf32>
    %114 = arith.mulf %112, %113 : vector<3x256xf32>
    %cst_73 = arith.constant dense<0.000000e+00> : vector<6x256xf32>
    %115 = tpu.matmul %7, %114, %cst_73 {dimension_numbers = #tpu.dot_dimension_numbers<[1], [0], [0], [1], [0, 0, 1, 1], [], []>} : vector<6x3xf32>, vector<3x256xf32>, vector<6x256xf32> -> vector<6x256xf32>
    %116 = arith.addf %111, %115 : vector<6x256xf32>
    %c1_i32_74 = arith.constant 1 : i32
    %117 = tpu.dynamic_rotate %102 by %c1_i32_74 dim 1 : vector<3x256xf32>, i32 -> vector<3x256xf32>
    %118 = vector.broadcast %27 : vector<1x256xf32> to vector<3x256xf32>
    %119 = arith.mulf %117, %118 : vector<3x256xf32>
    %cst_75 = arith.constant dense<0.000000e+00> : vector<6x256xf32>
    %120 = tpu.matmul %9, %119, %cst_75 {dimension_numbers = #tpu.dot_dimension_numbers<[1], [0], [0], [1], [0, 0, 1, 1], [], []>} : vector<6x3xf32>, vector<3x256xf32>, vector<6x256xf32> -> vector<6x256xf32>
    %121 = arith.addf %116, %120 : vector<6x256xf32>
    %cst_76 = arith.constant dense<0.000000e+00> : vector<6x256xf32>
    %122 = tpu.matmul %11, %102, %cst_76 {dimension_numbers = #tpu.dot_dimension_numbers<[1], [0], [0], [1], [0, 0, 1, 1], [], []>} : vector<6x3xf32>, vector<3x256xf32>, vector<6x256xf32> -> vector<6x256xf32>
    %123 = arith.addf %121, %122 : vector<6x256xf32>
    %c255_i32_77 = arith.constant 255 : i32
    %124 = tpu.dynamic_rotate %102 by %c255_i32_77 dim 1 : vector<3x256xf32>, i32 -> vector<3x256xf32>
    %125 = vector.broadcast %29 : vector<1x256xf32> to vector<3x256xf32>
    %126 = arith.mulf %124, %125 : vector<3x256xf32>
    %cst_78 = arith.constant dense<0.000000e+00> : vector<6x256xf32>
    %127 = tpu.matmul %13, %126, %cst_78 {dimension_numbers = #tpu.dot_dimension_numbers<[1], [0], [0], [1], [0, 0, 1, 1], [], []>} : vector<6x3xf32>, vector<3x256xf32>, vector<6x256xf32> -> vector<6x256xf32>
    %128 = arith.addf %123, %127 : vector<6x256xf32>
    %c241_i32_79 = arith.constant 241 : i32
    %129 = tpu.dynamic_rotate %102 by %c241_i32_79 dim 1 : vector<3x256xf32>, i32 -> vector<3x256xf32>
    %130 = vector.broadcast %31 : vector<1x256xf32> to vector<3x256xf32>
    %131 = arith.mulf %129, %130 : vector<3x256xf32>
    %cst_80 = arith.constant dense<0.000000e+00> : vector<6x256xf32>
    %132 = tpu.matmul %15, %131, %cst_80 {dimension_numbers = #tpu.dot_dimension_numbers<[1], [0], [0], [1], [0, 0, 1, 1], [], []>} : vector<6x3xf32>, vector<3x256xf32>, vector<6x256xf32> -> vector<6x256xf32>
    %133 = arith.addf %128, %132 : vector<6x256xf32>
    %c240_i32_81 = arith.constant 240 : i32
    %134 = tpu.dynamic_rotate %102 by %c240_i32_81 dim 1 : vector<3x256xf32>, i32 -> vector<3x256xf32>
    %135 = vector.broadcast %33 : vector<1x256xf32> to vector<3x256xf32>
    %136 = arith.mulf %134, %135 : vector<3x256xf32>
    %cst_82 = arith.constant dense<0.000000e+00> : vector<6x256xf32>
    %137 = tpu.matmul %17, %136, %cst_82 {dimension_numbers = #tpu.dot_dimension_numbers<[1], [0], [0], [1], [0, 0, 1, 1], [], []>} : vector<6x3xf32>, vector<3x256xf32>, vector<6x256xf32> -> vector<6x256xf32>
    %138 = arith.addf %133, %137 : vector<6x256xf32>
    %c239_i32_83 = arith.constant 239 : i32
    %139 = tpu.dynamic_rotate %102 by %c239_i32_83 dim 1 : vector<3x256xf32>, i32 -> vector<3x256xf32>
    %140 = vector.broadcast %35 : vector<1x256xf32> to vector<3x256xf32>
    %141 = arith.mulf %139, %140 : vector<3x256xf32>
    %cst_84 = arith.constant dense<0.000000e+00> : vector<6x256xf32>
    %142 = tpu.matmul %19, %141, %cst_84 {dimension_numbers = #tpu.dot_dimension_numbers<[1], [0], [0], [1], [0, 0, 1, 1], [], []>} : vector<6x3xf32>, vector<3x256xf32>, vector<6x256xf32> -> vector<6x256xf32>
    %143 = arith.addf %138, %142 : vector<6x256xf32>
    %cst_85 = arith.constant dense<0.000000e+00> : vector<6xf32>
    %144 = vector.multi_reduction <add>, %143, %cst_85 [1] : vector<6x256xf32> to vector<6xf32>
    %145 = vector.shape_cast %144 : vector<6xf32> to vector<6x1xf32>
    %cst_86 = arith.constant 2.560000e+02 : f32
    %146 = vector.broadcast %cst_86 : f32 to vector<6x1xf32>
    %147 = arith.divf %145, %146 : vector<6x1xf32>
    %148 = vector.broadcast %147 : vector<6x1xf32> to vector<6x256xf32>
    %149 = arith.subf %143, %148 : vector<6x256xf32>
    %150 = arith.mulf %149, %149 : vector<6x256xf32>
    %cst_87 = arith.constant dense<0.000000e+00> : vector<6xf32>
    %151 = vector.multi_reduction <add>, %150, %cst_87 [1] : vector<6x256xf32> to vector<6xf32>
    %152 = vector.shape_cast %151 : vector<6xf32> to vector<6x1xf32>
    %cst_88 = arith.constant 2.560000e+02 : f32
    %153 = vector.broadcast %cst_88 : f32 to vector<6x1xf32>
    %154 = arith.divf %152, %153 : vector<6x1xf32>
    %cst_89 = arith.constant 9.99999974E-6 : f32
    %155 = vector.broadcast %cst_89 : f32 to vector<6x1xf32>
    %156 = arith.addf %154, %155 : vector<6x1xf32>
    %157 = math.rsqrt %156 : vector<6x1xf32>
    %158 = arith.mulf %157, %0 : vector<6x1xf32>
    %159 = vector.broadcast %158 : vector<6x1xf32> to vector<6x256xf32>
    %160 = arith.mulf %149, %159 : vector<6x256xf32>
    %161 = vector.broadcast %1 : vector<6x1xf32> to vector<6x256xf32>
    %162 = arith.addf %160, %161 : vector<6x256xf32>
    %c1_90 = arith.constant 1 : index
    %c0_91 = arith.constant 0 : index
    %c0_92 = arith.constant 0 : index
    %163 = vector.load %arg5[%c1_90, %c0_91, %c0_92] : memref<2x6x256xf32, #tpu.memory_space<vmem>>, vector<1x6x256xf32>
    %164 = vector.shape_cast %163 : vector<1x6x256xf32> to vector<6x256xf32>
    %165 = vector.shape_cast %162 : vector<6x256xf32> to vector<1x6x256xf32>
    tpu.vector_store %arg5[%c1_90, %c0_91, %c0_92], %165 {strides = array<i32>} : memref<2x6x256xf32, #tpu.memory_space<vmem>>, vector<1x6x256xf32>,
    return
  }
  func.func @transform_0(%arg0: i32) -> (i32, i32, i32) {
    %c0_i32 = arith.constant 0 : i32
    %c0_i32_0 = arith.constant 0 : i32
    %c0_i32_1 = arith.constant 0 : i32
    return %arg0, %c0_i32, %c0_i32_0 : i32, i32, i32
  }
  func.func @transform_1(%arg0: i32) -> (i32, i32, i32) {
    %c0_i32 = arith.constant 0 : i32
    %c0_i32_0 = arith.constant 0 : i32
    %c0_i32_1 = arith.constant 0 : i32
    %c0_i32_2 = arith.constant 0 : i32
    return %c0_i32, %c0_i32_0, %c0_i32_1 : i32, i32, i32
  }
  func.func @transform_2(%arg0: i32) -> (i32, i32) {
    %c0_i32 = arith.constant 0 : i32
    %c0_i32_0 = arith.constant 0 : i32
    %c0_i32_1 = arith.constant 0 : i32
    return %c0_i32, %c0_i32_0 : i32, i32
  }
  func.func @transform_3(%arg0: i32) -> (i32, i32, i32) {
    %c0_i32 = arith.constant 0 : i32
    %c0_i32_0 = arith.constant 0 : i32
    %c0_i32_1 = arith.constant 0 : i32
    %c0_i32_2 = arith.constant 0 : i32
    return %c0_i32, %c0_i32_0, %c0_i32_1 : i32, i32, i32
  }
  func.func @transform_4(%arg0: i32) -> (i32, i32, i32) {
    %c0_i32 = arith.constant 0 : i32
    %c0_i32_0 = arith.constant 0 : i32
    %c0_i32_1 = arith.constant 0 : i32
    return %arg0, %c0_i32, %c0_i32_0 : i32, i32, i32
  }
}

</mosaic_0001>

<bundles_post_ra>
// kernel: tpu_custom_call.1
= control target key start
LH: loop header
LB: loop body
LE: loop exit
PB: predicated region body
PF: predicated region fallthrough
CT: control target
= control target key end

     0   :  { %v1888_v1 = vmov 0.0   ;;  %s1889_s17 = smov 17   ;;  %s1890_s18 = smov 16   ;;  %v58_v5 = vlaneseq  ;;  %vm100_vm2 = vcmask 1042432   ;;  %vm96_vm4 = vcmask 23552   ;;  %s2318_s0 = inlined_call_operand.vmem [shape: f32[2,3,256], index: 0, kind: input, shape index: {}]   ;;  %s2319_s3 = inlined_call_operand.vmem [shape: f32[9,1,256], index: 3, kind: input, shape index: {}]   ;;  %s2320_s1 = inlined_call_operand.vmem [shape: f32[9,6,3], index: 1, kind: input, shape index: {}]   ;;  %s2321_s2 = inlined_call_operand.vmem [shape: f32[6,2], index: 2, kind: input, shape index: {}]   ;;  %s2322_s4 = inlined_call_operand.vmem [shape: f32[2,6,256], index: 4, kind: output, shape index: {}]  }
   0x1   :  { %v1927_v0 = vld [vmem:[%s2318_s0] sm:$0x77]  ;;  %171 = vmatprep.mubr.f32.mxu0 %v1888_v1  ;;  %251 = vmatprep.mubr.f32.mxu1 %v1888_v1  ;;  %s1891_s19 = smov 15   ;;  %s1892_s20 = smov 1   ;;  %v1952_v3 = vld [vmem:[%s2318_s0 + $0x8] sm:$0x77] }
   0x2   :  { %54 = vrot.lane.b32.xlu1 %v1927_v0, %s1889_s17  ;;  %76 = vrot.lane.b32.xlu0 %v1927_v0, %s1890_s18  ;;  %v1935_v2 = vcombine.high %v1927_v0, %v1927_v0  ;;  %s1893_s21 = smov 127   ;;  %s1894_s22 = smov 113   ;;  %v1958_v4 = vcombine.high %v1952_v3, %v1952_v3  ;;  %v65_v6 = vshrl.u32 %v58_v5, 7  ;;  %v1976_v7 = vand.u32 127, %v58_v5  ;;  %v35_v10 = vld [vmem:[%s2319_s3] sm:$0x3] }
   0x3   :  { %s1895_s23 = smov 112   ;;  %s1896_s26 = smov 111   ;;  %v1804_v11 = vld [vmem:[%s2319_s3 + $0x2] sm:$0x3]  ;;  %v1805_v14 = vld [vmem:[%s2319_s3 + $0x4] sm:$0x3] }
   0x4   :  { %v1978_v8 = vsub.s32 0, %v65_v6  ;;  %v1980_v9 = vsub.s32 1, %v65_v6  ;;  %vm60_vm0 = vcmp.lt.s32.totalorder %v1976_v7, 17  ;;  %vm80_vm1 = vcmp.lt.s32.totalorder %v1976_v7, 16  ;;  %v1806_v31 = vld [vmem:[%s2319_s3 + $0x6] sm:$0x3] }
   0x5   :  { %vm262_vm3 = vcmp.lt.s32.totalorder %v1976_v7, 15  ;;  %v2030_v32 = vld [vmem:[%s2320_s1 + $0x8] sm:$0x3f]  ;;  %v2035_v33 = vld [vmem:[%s2320_s1] sm:$0x3f]  ;;  %vm364_vm5 = vcmp.lt.s32.totalorder %v1976_v7, 1 }
   0x6   :  { %56 = vrot.lane.b32.xlu1 %v1935_v2, %s1889_s17  ;;  %78 = vrot.lane.b32.xlu0 %v1935_v2, %s1890_s18  ;;  %v1994_v15 = vrot.slane %v35_v10, %v1978_v8  ;;  %v1997_v16 = vrot.slane %v1804_v11, %v1978_v8  ;;  %v2000_v17 = vrot.slane %v35_v10, %v1980_v9  ;;  %v1807_v42 = vld [vmem:[%s2319_s3 + $0xa] sm:$0x3]  ;;  %v2066_v43 = vld [vmem:[%s2320_s1 + $0x10] sm:$0x3f]  ;;  %vm546_vm6 = vcmp.lt.s32.totalorder %v1976_v7, 127 }
   0x7   :  { %v2003_v18 = vrot.slane %v1804_v11, %v1980_v9  ;;  %v2007_v21 = vrot.slane %v1805_v14, %v1978_v8  ;;  %v2010_v22 = vrot.slane %v1805_v14, %v1980_v9  ;;  %v2046_v38 = vrot.slane %v1806_v31, %v1978_v8  ;;  %v1808_v52 = vld [vmem:[%s2319_s3 + $0xc] sm:$0x3]  ;;  %v2093_v53 = vld [vmem:[%s2320_s1 + $0x18] sm:$0x3f]  ;;  %v2101_v54 = vld [vmem:[%s2320_s1 + $0x20] sm:$0x3f] }
   0x8   :  { %v2052_v41 = vrot.slane %v1806_v31, %v1980_v9  ;;  %v2075_v48 = vrot.slane %v1807_v42, %v1978_v8  ;;  %v2081_v51 = vrot.slane %v1807_v42, %v1980_v9  ;;  %v2110_v59 = vrot.slane %v1808_v52, %v1978_v8  ;;  %v1809_v63 = vld [vmem:[%s2319_s3 + $0xe] sm:$0x3]  ;;  %v2178_v31 = vld [vmem:[%s2320_s1 + $0x38] sm:$0x3f] }
   0x9   :  { %vm648_vm7 = vcmp.lt.s32.totalorder %v1976_v7, 113  ;;  %v2116_v62 = vrot.slane %v1808_v52, %v1980_v9  ;;  %vm750_vm8 = vcmp.lt.s32.totalorder %v1976_v7, 112  ;;  %v2145_v14 = vrot.slane %v1809_v63, %v1980_v9 }
   0xa   :  { %260 = vrot.lane.b32.xlu1 %v1935_v2, %s1891_s19  ;;  %258 = vrot.lane.b32.xlu0 %v1927_v0, %s1891_s19  ;;  %vm852_vm9 = vcmp.lt.s32.totalorder %v1976_v7, 111  ;;  %vm950_vm10 = vcmask 1045504  }
   0xe   :  { %362 = vrot.lane.b32.xlu1 %v1935_v2, %s1892_s20  ;;  %360 = vrot.lane.b32.xlu0 %v1927_v0, %s1892_s20 }
  0x12   :  { %544 = vrot.lane.b32.xlu1 %v1935_v2, %s1893_s21  ;;  %542 = vrot.lane.b32.xlu0 %v1927_v0, %s1893_s21 }
  0x16   :  { %646 = vrot.lane.b32.xlu1 %v1935_v2, %s1894_s22  ;;  %644 = vrot.lane.b32.xlu0 %v1927_v0, %s1894_s22 }
  0x1a   :  { %748 = vrot.lane.b32.xlu1 %v1935_v2, %s1895_s23  ;;  %746 = vrot.lane.b32.xlu0 %v1927_v0, %s1895_s23 }
  0x1e   :  { %850 = vrot.lane.b32.xlu1 %v1935_v2, %s1896_s26  ;;  %848 = vrot.lane.b32.xlu0 %v1927_v0, %s1896_s26 }
  0x22   :  { %1002 = vrot.lane.b32.xlu1 %v1958_v4, %s1890_s18  ;;  %1000 = vrot.lane.b32.xlu0 %v1952_v3, %s1890_s18 }
  0x26   :  { %994 = vrot.lane.b32.xlu1 %v1958_v4, %s1889_s17  ;;  %992 = vrot.lane.b32.xlu0 %v1952_v3, %s1889_s17 }
  0x2a   :  { %1164 = vrot.lane.b32.xlu1 %v1958_v4, %s1891_s19  ;;  %1162 = vrot.lane.b32.xlu0 %v1952_v3, %s1891_s19 }
  0x2e   :  { %1251 = vrot.lane.b32.xlu1 %v1958_v4, %s1892_s20  ;;  %1249 = vrot.lane.b32.xlu0 %v1952_v3, %s1892_s20 }
  0x32   :  { %1415 = vrot.lane.b32.xlu1 %v1958_v4, %s1893_s21  ;;  %1413 = vrot.lane.b32.xlu0 %v1952_v3, %s1893_s21 }
  0x36   :  { %1502 = vrot.lane.b32.xlu1 %v1958_v4, %s1894_s22  ;;  %1500 = vrot.lane.b32.xlu0 %v1952_v3, %s1894_s22 }
  0x3a   :  { %1589 = vrot.lane.b32.xlu1 %v1958_v4, %s1895_s23  ;;  %1587 = vrot.lane.b32.xlu0 %v1952_v3, %s1895_s23 }
  0x3e   :  { %1676 = vrot.lane.b32.xlu1 %v1958_v4, %s1896_s26  ;;  %1674 = vrot.lane.b32.xlu0 %v1952_v3, %s1896_s26 }
  0x74   :  { %v55_v12 = vpop.permute.xlu1 %54  ;;  %v77_v13 = vpop.permute.xlu0 %76 }
  0x78   :  { %v57_v19 = vpop.permute.xlu1 %56  ;;  %v79_v20 = vpop.permute.xlu0 %78 }
  0x79   :  { %v61_v23 = vsel %vm60_vm0, %v55_v12, %v57_v19  ;;  %v62_v24 = vsel %vm60_vm0, %v57_v19, %v55_v12  ;;  %v81_v25 = vsel %vm80_vm1, %v77_v13, %v79_v20  ;;  %v82_v26 = vsel %vm80_vm1, %v79_v20, %v77_v13  ;;  %v1810_v19 = vld [vmem:[%s2319_s3 + $0x10] sm:$0x3] }
  0x7a   :  { %v74_v27 = vmul.f32 %v1994_v15, %v62_v24  ;;  %v94_v28 = vmul.f32 %v1997_v16, %v82_v26  ;;  %v75_v29 = vmul.f32 %v2000_v17, %v61_v23  ;;  %v95_v30 = vmul.f32 %v2003_v18, %v81_v25  ;;  %v2155_v20 = vld [vmem:[%s2320_s1 + $0x30] sm:$0x3f] }
  0x7b   :  { %v2142_v13 = vrot.slane %v1809_v63, %v1978_v8 }
  0x7c   :  { %1814 = vmatprep.subr.msk.mxu1 %vm100_vm2, %v75_v29  ;;  %v261_v34 = vpop.permute.xlu1 %260  ;;  %1811 = vmatprep.subr.msk.mxu0 %vm100_vm2, %v95_v30  ;;  %v259_v35 = vpop.permute.xlu0 %258  ;;  %v2168_v29 = vrot.slane %v1810_v19, %v1978_v8  ;;  %v2171_v30 = vrot.slane %v1810_v19, %v1980_v9 }
  0x7d   :  { %v263_v36 = vsel %vm262_vm3, %v259_v35, %v261_v34  ;;  %v264_v37 = vsel %vm262_vm3, %v261_v34, %v259_v35  ;;  %1812 = vmatpush1.msk.msra.mxu0 %vm100_vm2, %v94_v28  ;;  %1815 = vmatpush1.msk.msra.mxu1 %vm100_vm2, %v74_v27 }
  0x7e   :  { %v276_v39 = vmul.f32 %v2007_v21, %v264_v37  ;;  %v277_v40 = vmul.f32 %v2010_v22, %v263_v36  ;;  %1813 = vmatmul.mubr.msk.f32.vlgmr.msra.gmra.mxu0 %vm96_vm4, %v2030_v32  ;;  %1816 = vmatmul.mubr.msk.f32.vlgmr.msra.gmra.mxu1 %vm96_vm4, %v2035_v33 }
  0x7f   :  { %453 = vmatprep.mubr.f32.mxu1 %v1888_v1  ;;  %351 = vmatprep.mubr.f32.mxu0 %v1888_v1 }
  0x80   :  { %v363_v44 = vpop.permute.xlu1 %362  ;;  %1817 = vmatprep.subr.msk.mxu0 %vm100_vm2, %v277_v40  ;;  %v361_v45 = vpop.permute.xlu0 %360 }
  0x81   :  { %v365_v46 = vsel %vm364_vm5, %v361_v45, %v363_v44  ;;  %v366_v47 = vsel %vm364_vm5, %v363_v44, %v361_v45  ;;  %1818 = vmatpush1.msk.msra.mxu0 %vm100_vm2, %v276_v39  ;;  %v2194_v39 = vld [vmem:[%s2320_s1 + $0x40] sm:$0x3f] }
  0x82   :  { %v378_v49 = vmul.f32 %v2046_v38, %v366_v47  ;;  %v379_v50 = vmul.f32 %v2052_v41, %v365_v46  ;;  %1819 = vmatmul.mubr.msk.f32.vlgmr.msra.gmra.mxu0 %vm96_vm4, %v2066_v43  ;;  %1823 = vmatprep.subr.msk.mxu0 %vm100_vm2, %v1935_v2 }
  0x83   :  { %1824 = vmatpush1.msk.msra.mxu0 %vm100_vm2, %v1927_v0  ;;  %533 = vmatprep.mubr.f32.mxu0 %v1888_v1  ;;  %v2129_v0 = vld [vmem:[%s2320_s1 + $0x28] sm:$0x3f] }
  0x84   :  { %v545_v55 = vpop.permute.xlu1 %544  ;;  %1820 = vmatprep.subr.msk.mxu1 %vm100_vm2, %v379_v50  ;;  %v543_v56 = vpop.permute.xlu0 %542 }
  0x85   :  { %v547_v57 = vsel %vm546_vm6, %v543_v56, %v545_v55  ;;  %v548_v58 = vsel %vm546_vm6, %v545_v55, %v543_v56  ;;  %1821 = vmatpush1.msk.msra.mxu1 %vm100_vm2, %v378_v49 }
  0x86   :  { %v560_v60 = vmul.f32 %v2075_v48, %v547_v57  ;;  %v561_v61 = vmul.f32 %v2081_v51, %v548_v58  ;;  %1822 = vmatmul.mubr.msk.f32.vlgmr.msra.gmra.mxu1 %vm96_vm4, %v2093_v53  ;;  %1825 = vmatmul.mubr.msk.f32.vlgmr.msra.gmra.mxu0 %vm96_vm4, %v2101_v54 }
  0x87   :  { %635 = vmatprep.mubr.f32.mxu1 %v1888_v1  ;;  %737 = vmatprep.mubr.f32.mxu0 %v1888_v1 }
  0x88   :  { %v647_v2 = vpop.permute.xlu1 %646  ;;  %1826 = vmatprep.subr.msk.mxu1 %vm100_vm2, %v561_v61  ;;  %v645_v5 = vpop.permute.xlu0 %644 }
  0x89   :  { %v649_v6 = vsel %vm648_vm7, %v645_v5, %v647_v2  ;;  %v650_v10 = vsel %vm648_vm7, %v647_v2, %v645_v5  ;;  %1827 = vmatpush1.msk.msra.mxu1 %vm100_vm2, %v560_v60 }
  0x8a   :  { %v662_v11 = vmul.f32 %v2110_v59, %v649_v6  ;;  %v663_v12 = vmul.f32 %v2116_v62, %v650_v10  ;;  %1828 = vmatmul.mubr.msk.f32.vlgmr.msra.gmra.mxu1 %vm96_vm4, %v2129_v0 }
  0x8b   :  { %839 = vmatprep.mubr.f32.mxu1 %v1888_v1 }
  0x8c   :  { %v749_v23 = vpop.permute.xlu1 %748  ;;  %1829 = vmatprep.subr.msk.mxu0 %vm100_vm2, %v663_v12  ;;  %v747_v24 = vpop.permute.xlu0 %746 }
  0x8d   :  { %v751_v25 = vsel %vm750_vm8, %v747_v24, %v749_v23  ;;  %v752_v26 = vsel %vm750_vm8, %v749_v23, %v747_v24  ;;  %1830 = vmatpush1.msk.msra.mxu0 %vm100_vm2, %v662_v11 }
  0x8e   :  { %v764_v27 = vmul.f32 %v2142_v13, %v751_v25  ;;  %v765_v28 = vmul.f32 %v2145_v14, %v752_v26  ;;  %1831 = vmatmul.mubr.msk.f32.vlgmr.msra.gmra.mxu0 %vm96_vm4, %v2155_v20 }
  0x8f   :  { %941 = vmatprep.mubr.f32.mxu0 %v1888_v1 }
  0x90   :  { %v851_v34 = vpop.permute.xlu1 %850  ;;  %1832 = vmatprep.subr.msk.mxu1 %vm100_vm2, %v765_v28  ;;  %v849_v35 = vpop.permute.xlu0 %848 }
  0x91   :  { %v853_v8 = vsel %vm852_vm9, %v849_v35, %v851_v34  ;;  %v854_v9 = vsel %vm852_vm9, %v851_v34, %v849_v35  ;;  %1833 = vmatpush1.msk.msra.mxu1 %vm100_vm2, %v764_v27 }
  0x92   :  { %v866_v36 = vmul.f32 %v2168_v29, %v853_v8  ;;  %v867_v37 = vmul.f32 %v2171_v30, %v854_v9  ;;  %1834 = vmatmul.mubr.msk.f32.vlgmr.msra.gmra.mxu1 %vm96_vm4, %v2178_v31 }
  0x93   :  { %1078 = vmatprep.mubr.f32.mxu1 %v1888_v1 }
  0x94   :  { %v1003_v40 = vpop.permute.xlu1 %1002  ;;  %1835 = vmatprep.subr.msk.mxu0 %vm100_vm2, %v867_v37  ;;  %v1001_v42 = vpop.permute.xlu0 %1000 }
  0x95   :  { %v1004_v44 = vsel %vm80_vm1, %v1001_v42, %v1003_v40  ;;  %v1005_v45 = vsel %vm80_vm1, %v1003_v40, %v1001_v42  ;;  %1836 = vmatpush1.msk.msra.mxu0 %vm100_vm2, %v866_v36 }
  0x96   :  { %v1006_v46 = vmul.f32 %v1005_v45, %v1997_v16  ;;  %v1007_v47 = vmul.f32 %v1004_v44, %v2003_v18  ;;  %1837 = vmatmul.mubr.msk.f32.vlgmr.msra.gmra.mxu0 %vm96_vm4, %v2194_v39 }
  0x97   :  { %1155 = vmatprep.mubr.f32.mxu0 %v1888_v1 }
  0x98   :  { %v995_v49 = vpop.permute.xlu1 %994  ;;  %1839 = vmatprep.subr.msk.mxu1 %vm100_vm2, %v1007_v47  ;;  %v993_v50 = vpop.permute.xlu0 %992 }
  0x99   :  { %v996_v52 = vsel %vm60_vm0, %v993_v50, %v995_v49  ;;  %v997_v55 = vsel %vm60_vm0, %v995_v49, %v993_v50  ;;  %1840 = vmatpush1.msk.msra.mxu1 %vm100_vm2, %v1006_v46 }
  0x9a   :  { %v998_v16 = vmul.f32 %v997_v55, %v1994_v15  ;;  %v999_v18 = vmul.f32 %v996_v52, %v2000_v17  ;;  %1841 = vmatmul.mubr.msk.f32.vlgmr.msra.gmra.mxu1 %vm96_vm4, %v2030_v32 }
  0x9b   :  { %1240 = vmatprep.mubr.f32.mxu1 %v1888_v1 }
  0x9c   :  { %v1165_v56 = vpop.permute.xlu1 %1164  ;;  %1842 = vmatprep.subr.msk.mxu0 %vm100_vm2, %v999_v18  ;;  %v1163_v57 = vpop.permute.xlu0 %1162 }
  0x9d   :  { %v1166_v58 = vsel %vm262_vm3, %v1163_v57, %v1165_v56  ;;  %v1167_v60 = vsel %vm262_vm3, %v1165_v56, %v1163_v57  ;;  %1843 = vmatpush1.msk.msra.mxu0 %vm100_vm2, %v998_v16 }
  0x9e   :  { %v1168_v15 = vmul.f32 %v1167_v60, %v2007_v21  ;;  %v1169_v17 = vmul.f32 %v1166_v58, %v2010_v22  ;;  %1844 = vmatmul.mubr.msk.f32.vlgmr.msra.gmra.mxu0 %vm96_vm4, %v2035_v33 }
  0x9f   :  { %1327 = vmatprep.mubr.f32.mxu0 %v1888_v1 }
  0xa0   :  { %v1252_v32 = vpop.permute.xlu1 %1251  ;;  %1845 = vmatprep.subr.msk.mxu1 %vm100_vm2, %v1169_v17  ;;  %v1250_v61 = vpop.permute.xlu0 %1249 }
  0xa1   :  { %v1253_v63 = vsel %vm364_vm5, %v1250_v61, %v1252_v32  ;;  %v1254_v2 = vsel %vm364_vm5, %v1252_v32, %v1250_v61  ;;  %1846 = vmatpush1.msk.msra.mxu1 %vm100_vm2, %v1168_v15 }
  0xa2   :  { %v1255_v21 = vmul.f32 %v1254_v2, %v2046_v38  ;;  %v1256_v22 = vmul.f32 %v1253_v63, %v2052_v41  ;;  %1847 = vmatmul.mubr.msk.f32.vlgmr.msra.gmra.mxu1 %vm96_vm4, %v2066_v43  ;;  %1851 = vmatprep.subr.msk.mxu1 %vm100_vm2, %v1958_v4 }
  0xa3   :  { %1852 = vmatpush1.msk.msra.mxu1 %vm100_vm2, %v1952_v3  ;;  %1404 = vmatprep.mubr.f32.mxu1 %v1888_v1 }
  0xa4   :  { %v1416_v33 = vpop.permute.xlu1 %1415  ;;  %1848 = vmatprep.subr.msk.mxu0 %vm100_vm2, %v1256_v22  ;;  %v1414_v5 = vpop.permute.xlu0 %1413 }
  0xa5   :  { %v1417_v38 = vsel %vm546_vm6, %v1414_v5, %v1416_v33  ;;  %v1418_v41 = vsel %vm546_vm6, %v1416_v33, %v1414_v5  ;;  %1849 = vmatpush1.msk.msra.mxu0 %vm100_vm2, %v1255_v21 }
  0xa6   :  { %v1419_v43 = vmul.f32 %v1417_v38, %v2075_v48  ;;  %v1420_v4 = vmul.f32 %v1418_v41, %v2081_v51  ;;  %1850 = vmatmul.mubr.msk.f32.vlgmr.msra.gmra.mxu0 %vm96_vm4, %v2093_v53  ;;  %1853 = vmatmul.mubr.msk.f32.vlgmr.msra.gmra.mxu1 %vm96_vm4, %v2101_v54 }
  0xa7   :  { %1491 = vmatprep.mubr.f32.mxu0 %v1888_v1  ;;  %1578 = vmatprep.mubr.f32.mxu1 %v1888_v1 }
  0xa8   :  { %v1503_v3 = vpop.permute.xlu1 %1502  ;;  %1854 = vmatprep.subr.msk.mxu0 %vm100_vm2, %v1420_v4  ;;  %v1501_v6 = vpop.permute.xlu0 %1500 }
  0xa9   :  { %v1504_v10 = vsel %vm648_vm7, %v1501_v6, %v1503_v3  ;;  %v1505_v48 = vsel %vm648_vm7, %v1503_v3, %v1501_v6  ;;  %1855 = vmatpush1.msk.msra.mxu0 %vm100_vm2, %v1419_v43 }
  0xaa   :  { %v1506_v51 = vmul.f32 %v1504_v10, %v2110_v59  ;;  %v1507_v53 = vmul.f32 %v1505_v48, %v2116_v62  ;;  %1856 = vmatmul.mubr.msk.f32.vlgmr.msra.gmra.mxu0 %vm96_vm4, %v2129_v0 }
  0xab   :  { %1665 = vmatprep.mubr.f32.mxu0 %v1888_v1 }
  0xac   :  { %v1590_v54 = vpop.permute.xlu1 %1589  ;;  %1857 = vmatprep.subr.msk.mxu1 %vm100_vm2, %v1507_v53  ;;  %v1588_v11 = vpop.permute.xlu0 %1587 }
  0xad   :  { %v1591_v12 = vsel %vm750_vm8, %v1588_v11, %v1590_v54  ;;  %v1592_v19 = vsel %vm750_vm8, %v1590_v54, %v1588_v11  ;;  %1858 = vmatpush1.msk.msra.mxu1 %vm100_vm2, %v1506_v51 }
  0xae   :  { %v1593_v59 = vmul.f32 %v1591_v12, %v2142_v13  ;;  %v1594_v62 = vmul.f32 %v1592_v19, %v2145_v14  ;;  %1859 = vmatmul.mubr.msk.f32.vlgmr.msra.gmra.mxu1 %vm96_vm4, %v2155_v20 }
  0xaf   :  { %1752 = vmatprep.mubr.f32.mxu1 %v1888_v1 }
  0xb0   :  { %v1677_v0 = vpop.permute.xlu1 %1676  ;;  %1860 = vmatprep.subr.msk.mxu0 %vm100_vm2, %v1594_v62  ;;  %v1675_v23 = vpop.permute.xlu0 %1674 }
  0xb1   :  { %v1678_v24 = vsel %vm852_vm9, %v1675_v23, %v1677_v0  ;;  %v1679_v25 = vsel %vm852_vm9, %v1677_v0, %v1675_v23  ;;  %1861 = vmatpush1.msk.msra.mxu0 %vm100_vm2, %v1593_v59 }
  0xb2   :  { %v1680_v13 = vmul.f32 %v1678_v24, %v2168_v29  ;;  %v1681_v14 = vmul.f32 %v1679_v25, %v2171_v30  ;;  %1862 = vmatmul.mubr.msk.f32.vlgmr.msra.gmra.mxu0 %vm96_vm4, %v2178_v31 }
  0xb4   :  { %1863 = vmatprep.subr.msk.mxu1 %vm100_vm2, %v1681_v14 }
  0xb5   :  { %1864 = vmatpush1.msk.msra.mxu1 %vm100_vm2, %v1680_v13 }
  0xb6   :  { %1865 = vmatmul.mubr.msk.f32.vlgmr.msra.gmra.mxu1 %vm96_vm4, %v2194_v39 }
 0x13e   :  { %v173_v1 = vpop.f32.mrf.mxu0  ;;  %v253_v20 = vpop.f32.mrf.mxu1 }
 0x13f   :  { %v254_v7 = vadd.f32 %v253_v20, %v173_v1 }
 0x140   :  { %v175_v26 = vpop.f32.mrf.mxu0  ;;  %v255_v27 = vpop.f32.mrf.mxu1 }
 0x141   :  { %v256_v28 = vadd.f32 %v255_v27, %v175_v26 }
 0x142   :  { %v353_v34 = vpop.f32.mrf.mxu0 }
 0x143   :  { %v358_v29 = vadd.f32 %v353_v34, %v254_v7 }
 0x144   :  { %v355_v35 = vpop.f32.mrf.mxu0 }
 0x145   :  { %v359_v30 = vadd.f32 %v355_v35, %v256_v28 }
 0x146   :  { %v455_v8 = vpop.f32.mrf.mxu1  ;;  %v535_v9 = vpop.f32.mrf.mxu0 }
 0x147   :  { %v460_v31 = vadd.f32 %v455_v8, %v358_v29 }
 0x148   :  { %v457_v36 = vpop.f32.mrf.mxu1  ;;  %v537_v37 = vpop.f32.mrf.mxu0 }
 0x149   :  { %v461_v40 = vadd.f32 %v457_v36, %v359_v30  ;;  %v540_v42 = vadd.f32 %v535_v9, %v460_v31 }
 0x14a   :  { %v637_v44 = vpop.f32.mrf.mxu1 }
 0x14b   :  { %v541_v45 = vadd.f32 %v537_v37, %v461_v40  ;;  %v642_v39 = vadd.f32 %v637_v44, %v540_v42 }
 0x14c   :  { %v639_v46 = vpop.f32.mrf.mxu1 }
 0x14d   :  { %v643_v47 = vadd.f32 %v639_v46, %v541_v45 }
 0x14e   :  { %v739_v49 = vpop.f32.mrf.mxu0 }
 0x14f   :  { %v744_v50 = vadd.f32 %v739_v49, %v642_v39  ;;  %v1897_v39 = vmov 0  }
 0x150   :  { %v741_v52 = vpop.f32.mrf.mxu0  ;;  %1879 = vset.pattern.permute.xlu1 %v1897_v39  ;;  %1880 = vset.pattern.permute.xlu0 %v1897_v39 }
 0x151   :  { %v745_v55 = vadd.f32 %v741_v52, %v643_v47 }
 0x152   :  { %v841_v16 = vpop.f32.mrf.mxu1 }
 0x153   :  { %v846_v18 = vadd.f32 %v841_v16, %v744_v50 }
 0x154   :  { %v843_v56 = vpop.f32.mrf.mxu1 }
 0x155   :  { %v847_v57 = vadd.f32 %v843_v56, %v745_v55 }
 0x156   :  { %v943_v58 = vpop.f32.mrf.mxu0 }
 0x157   :  { %v948_v60 = vadd.f32 %v943_v58, %v846_v18 }
 0x158   :  { %v945_v15 = vpop.f32.mrf.mxu0 }
 0x159   :  { %v949_v17 = vadd.f32 %v945_v15, %v847_v57  ;;  %v951_v32 = vsel %vm950_vm10, %v948_v60, 0.0  ;;  %v17_v15 = vld [vmem:[%s2321_s2] sm:$0x3f] }
 0x15a   :  { %v1080_v61 = vpop.f32.mrf.mxu1 }
 0x15b   :  { %v952_v63 = vsel %vm950_vm10, %v949_v17, 0.0 }
 0x15c   :  { %v953_v2 = vadd.f32 %v952_v63, %v951_v32  ;;  %v1082_v21 = vpop.f32.mrf.mxu1 }
 0x15e   :  { %954 = vadd.xlane.f32.xlu0 %v953_v2  ;;  %v1157_v22 = vpop.f32.mrf.mxu0 }
 0x15f   :  { %v1158_v33 = vadd.f32 %v1157_v22, %v1080_v61  ;;  %v1898_v61 = vmov 1  }
 0x160   :  { %v1159_v5 = vpop.f32.mrf.mxu0 }
 0x161   :  { %v1160_v38 = vadd.f32 %v1159_v5, %v1082_v21 }
 0x162   :  { %v1242_v41 = vpop.f32.mrf.mxu1 }
 0x163   :  { %v1247_v43 = vadd.f32 %v1242_v41, %v1158_v33 }
 0x164   :  { %v1244_v4 = vpop.f32.mrf.mxu1 }
 0x165   :  { %v1248_v3 = vadd.f32 %v1244_v4, %v1160_v38 }
 0x166   :  { %v1329_v6 = vpop.f32.mrf.mxu0  ;;  %v1406_v10 = vpop.f32.mrf.mxu1 }
 0x167   :  { %v1334_v48 = vadd.f32 %v1329_v6, %v1247_v43 }
 0x168   :  { %v1331_v51 = vpop.f32.mrf.mxu0  ;;  %v1408_v11 = vpop.f32.mrf.mxu1 }
 0x169   :  { %v1335_v53 = vadd.f32 %v1331_v51, %v1248_v3  ;;  %v1411_v54 = vadd.f32 %v1406_v10, %v1334_v48 }
 0x16a   :  { %v1493_v12 = vpop.f32.mrf.mxu0 }
 0x16b   :  { %v1412_v19 = vadd.f32 %v1408_v11, %v1335_v53  ;;  %v1498_v59 = vadd.f32 %v1493_v12, %v1411_v54 }
 0x16c   :  { %v1495_v62 = vpop.f32.mrf.mxu0 }
 0x16d   :  { %v1499_v23 = vadd.f32 %v1495_v62, %v1412_v19 }
 0x16e   :  { %v1580_v0 = vpop.f32.mrf.mxu1 }
 0x16f   :  { %v1585_v24 = vadd.f32 %v1580_v0, %v1498_v59 }
 0x170   :  { %v1582_v25 = vpop.f32.mrf.mxu1 }
 0x171   :  { %v1586_v1 = vadd.f32 %v1582_v25, %v1499_v23 }
 0x172   :  { %v1667_v13 = vpop.f32.mrf.mxu0 }
 0x173   :  { %v1672_v20 = vadd.f32 %v1667_v13, %v1585_v24 }
 0x174   :  { %v1669_v14 = vpop.f32.mrf.mxu0 }
 0x175   :  { %v1673_v26 = vadd.f32 %v1669_v14, %v1586_v1 }
 0x176   :  { %v1754_v7 = vpop.f32.mrf.mxu1 }
 0x177   :  { %v1759_v27 = vadd.f32 %v1754_v7, %v1672_v20 }
 0x178   :  { %v1756_v28 = vpop.f32.mrf.mxu1 }
 0x179   :  { %v1760_v34 = vadd.f32 %v1756_v28, %v1673_v26  ;;  %v1761_v29 = vsel %vm950_vm10, %v1759_v27, 0.0 }
 0x17b   :  { %v1762_v35 = vsel %vm950_vm10, %v1760_v34, 0.0 }
 0x17c   :  { %v1763_v30 = vadd.f32 %v1762_v35, %v1761_v29 }
 0x17e   :  { %1764 = vadd.xlane.f32.xlu1 %v1763_v30 }
 0x1e7   :  { %v955_v8 = vpop.xlane.xlu0 %954 }
 0x1e8   :  { %v957_v9 = vmul.f32 0.00390625, %v955_v8 }
 0x1ea   :  { %v958_v31 = vsub.f32 %v948_v60, %v957_v9  ;;  %v959_v36 = vsub.f32 %v949_v17, %v957_v9 }
 0x1ec   :  { %v960_v37 = vmul.f32 %v958_v31, %v958_v31  ;;  %v961_v40 = vmul.f32 %v959_v36, %v959_v36 }
 0x1ee   :  { %v962_v42 = vsel %vm950_vm10, %v960_v37, 0.0  ;;  %v963_v44 = vsel %vm950_vm10, %v961_v40, 0.0 }
 0x1ef   :  { %v964_v45 = vadd.f32 %v963_v44, %v962_v42 }
 0x1f1   :  { %965 = vadd.xlane.f32.xlu0 %v964_v45 }
 0x207   :  { %v1765_v46 = vpop.xlane.xlu1 %1764 }
 0x208   :  { %v1766_v47 = vmul.f32 0.00390625, %v1765_v46 }
 0x20a   :  { %v1767_v49 = vsub.f32 %v1759_v27, %v1766_v47  ;;  %v1768_v50 = vsub.f32 %v1760_v34, %v1766_v47 }
 0x20c   :  { %v1769_v52 = vmul.f32 %v1767_v49, %v1767_v49  ;;  %v1770_v55 = vmul.f32 %v1768_v50, %v1768_v50 }
 0x20e   :  { %v1771_v16 = vsel %vm950_vm10, %v1769_v52, 0.0  ;;  %v1772_v18 = vsel %vm950_vm10, %v1770_v55, 0.0 }
 0x20f   :  { %v1773_v56 = vadd.f32 %v1772_v18, %v1771_v16 }
 0x211   :  { %1774 = vadd.xlane.f32.xlu0 %v1773_v56 }
 0x27a   :  { %v966_v57 = vpop.xlane.xlu0 %965 }
 0x27b   :  { %v967_v58 = vmul.f32 0.00390625, %v966_v57 }
 0x27d   :  { %v968_v60 = vadd.f32 1e-05, %v967_v58 }
 0x27f   :  { %1884 = vrsqrt.f32 %v968_v60 }
 0x28c   :  { %v1885_v17 = vpop.eup %1884 }
 0x28d   :  { %v970_v32 = vmul.f32 %v1885_v17, %v17_v15 }
 0x28f   :  { %973 = vperm.xlu1 %1879, %v970_v32  }
 0x293   :  { %1881 = vset.pattern.permute.xlu1 %v1898_v61 }
 0x294   :  { %980 = vperm.xlu1 %1881, %v17_v15  }
 0x29a   :  { %v1775_v63 = vpop.xlane.xlu0 %1774 }
 0x29b   :  { %v1776_v2 = vmul.f32 0.00390625, %v1775_v63 }
 0x29d   :  { %v1777_v21 = vadd.f32 1e-05, %v1776_v2 }
 0x29f   :  { %1886 = vrsqrt.f32 %v1777_v21 }
 0x2ac   :  { %v1887_v22 = vpop.eup %1886 }
 0x2ad   :  { %v1779_v33 = vmul.f32 %v1887_v22, %v17_v15 }
 0x2af   :  { %1782 = vperm.xlu0 %1880, %v1779_v33  }
 0x30a   :  { %v974_v5 = vpop.permute.xlu1 %973 }
 0x30b   :  { %v976_v38 = vmul.f32 %v974_v5, %v958_v31  ;;  %v977_v41 = vmul.f32 %v974_v5, %v959_v36 }
 0x30f   :  { %v981_v43 = vpop.permute.xlu1 %980 }
 0x310   :  { %v983_v4 = vadd.f32 %v981_v43, %v976_v38  ;;  %v984_v3 = vadd.f32 %v981_v43, %v977_v41 }
 0x312   :  { %985 = vst [vmem:[%s2322_s4] sm:$0x3f] %v983_v4  ;;  %986 = vst [vmem:[%s2322_s4 + $0x8] sm:$0x3f] %v984_v3 }
 0x32a   :  { %v1783_v6 = vpop.permute.xlu0 %1782 }
 0x32b   :  { %v1785_v10 = vmul.f32 %v1783_v6, %v1767_v49  ;;  %v1786_v48 = vmul.f32 %v1783_v6, %v1768_v50 }
 0x32d   :  { %v1787_v51 = vadd.f32 %v1785_v10, %v981_v43  ;;  %v1788_v53 = vadd.f32 %v1786_v48, %v981_v43 }
 0x32f   :  { %1866 = vst [vmem:[%s2322_s4 + $0x10] sm:$0x3f] %v1787_v51  ;;  %1867 = vst [vmem:[%s2322_s4 + $0x18] sm:$0x3f] %v1788_v53 }

</bundles_post_ra>
